<compile_context>
chip_gen: v7x
topology: tpu7x:2x2x1
jax: 0.10.0
libtpu: 0.0.40
codegen_flags: <defaults>
</compile_context>

<pallas_src>
import math

import jax
import jax.numpy as jnp
import numpy as np
from jax import lax
from jax.experimental import pallas as pl
from jax.experimental.pallas import tpu as pltpu


def _ceil_div(a, b):
    return -(-a // b)


def _round_up(a, b):
    return _ceil_div(a, b) * b


def _round_down(a, b):
    return (a // b) * b


def _num_tensorcores():
    """Best-effort TensorCores-per-chip (v7x / v5p / v4 megacore = 2, else 1)."""
    try:
        dev = jax.devices()[0]
        kind = str(getattr(dev, "device_kind", "")).lower()
    except Exception:
        return 1
    for tag in ("v7", "v5p", "v4"):
        if tag in kind:
            return 2
    return 1


def _vmem_capacity_bytes():
    """Physical VMEM per core; falls back to the smallest modern chip (v7x)."""
    try:
        info = pltpu.get_tpu_info()
        cap = int(getattr(info, "vmem_capacity_bytes", 0))
        if cap > 0:
            return cap
    except Exception:
        pass
    return 64 << 20


def _time2vec_kernel(t_ref, expand_ref, w_ref, b_ref, mask_ref, out_ref):
    """One lane-dense output block.

    t_ref:      (G, R)  packed time values, transposed so the long axis is lanes
    expand_ref: (G, L)  constant 0/1 one-hot lane-expansion matrix (resident)
    w_ref:      (1, L)  fused [linear_w, periodic_w...] tiled G times (resident)
    b_ref:      (1, L)  fused [linear_b, periodic_b...] tiled G times (resident)
    mask_ref:   (1, L)  1.0 on linear columns, 0.0 on sin columns (resident)
    out_ref:    (R, L)  lane-dense output block (L is a multiple of 128)
    """
    # Lane expansion on the (otherwise idle) MXU, contracting the small G axis.
    # HIGHEST precision keeps the one-hot * f32 reconstruction of t bit-exact
    # regardless of the chip's native MXU pass decomposition.
    t_exp = lax.dot_general(
        t_ref[...], expand_ref[...],
        dimension_numbers=(((0,), (0,)), ((), ())),
        preferred_element_type=jnp.float32,
        precision=lax.Precision.HIGHEST,
    )                                                        # (R, L)
    val = t_exp * w_ref[...] + b_ref[...]                    # affine everywhere
    out = jnp.where(mask_ref[...] > 0.5, val, jnp.sin(val))  # col 0 linear, rest sin
    out_ref[...] = out.astype(out_ref.dtype)


def time2vec_reference(t, linear_w, linear_b, periodic_w, periodic_b):
    """Pure-JAX reference mirroring the PyTorch forward."""
    t = jnp.asarray(t, jnp.float32)
    if t.ndim == 1:
        t = t[:, None]
    pw = jnp.asarray(periodic_w, jnp.float32).reshape(-1)
    pb = jnp.asarray(periodic_b, jnp.float32).reshape(-1)
    linear_part = jnp.asarray(linear_w, jnp.float32) * t + jnp.asarray(linear_b, jnp.float32)
    sin_input = t @ pw[None, :] + pb[None, :]
    return jnp.concatenate([linear_part, jnp.sin(sin_input)], axis=1)


def time2vec_forward(t, linear_w, linear_b, periodic_w, periodic_b,
                     *, use_pallas=None, out_dtype=jnp.float32, block_rows=None):
    """Pallas Time2Vec forward.

    t:           (B,) or (B, 1)
    linear_w/b:  scalars
    periodic_w/b:(D-1,) (any shape with D-1 elements)
    out_dtype:   float32 (default) or bfloat16 to halve the dominant HBM write
    block_rows:  optional override of the row-tile size (testing / tuning)
    returns:     (B, D) in `out_dtype`
    """
    t = jnp.asarray(t, jnp.float32).reshape(-1)
    B = t.shape[0]
    pw = jnp.asarray(periodic_w, jnp.float32).reshape(-1)
    pb = jnp.asarray(periodic_b, jnp.float32).reshape(-1)
    pdim = pw.shape[0]
    D = pdim + 1

    # Lane-dense flattening: output viewed as (rows, L) full-width vreg rows.
    L = D * 128 // math.gcd(D, 128)   # smallest multiple of both D and 128
    G = L // D                        # batch elements packed per output row

    if use_pallas is None:
        # Tiny problems: launch + DMA setup dominates; let XLA fuse it.
        use_pallas = (B * D >= 8 * 1024)
    if (not use_pallas) or L > 8192:
        # L > 8192 only for pathological D; resident expansion would waste VMEM.
        return time2vec_reference(t, linear_w, linear_b, pw, pb).astype(out_dtype)

    out_isz = jnp.dtype(out_dtype).itemsize
    rows = _ceil_div(B, G)
    ncores = _num_tensorcores()

    # ---- row-tile sizing: ~8 MiB lane-dense output blocks, VMEM-budgeted ----
    vmem_budget = min((_vmem_capacity_bytes() * 3) // 4, 96 << 20)
    G_pad = _round_up(G, 8)
    # Residents: expand (G,L) + w/b/mask (1,L each, sublane-padded), x2 buffers.
    resident_bytes = 2 * (G_pad * L + 3 * 8 * L) * 4
    # Per-row VMEM: 2x out block + 2x t block (both double-buffered) plus a
    # conservative allowance of ~5 block-sized f32 intermediates in the kernel.
    per_row_bytes = 2 * L * out_isz + 2 * G_pad * 4 + 5 * L * 4
    r_cap = max(128, _round_down(
        max(128, (vmem_budget - resident_bytes - (2 << 20)) // per_row_bytes), 128))
    r_target = max(128, _round_down(max(128, (8 << 20) // (L * out_isz)), 128))
    if block_rows is not None:
        r_target = max(128, _round_down(int(block_rows), 128))
    r_target = max(128, min(r_target, r_cap))

    if rows <= r_target and (ncores == 1 or rows < 256 * ncores):
        R = rows                       # single block == full array dims (allowed)
        num_blocks = 1
    else:
        num_blocks = _ceil_div(rows, r_target)
        if ncores > 1:
            # even-ish multi-block split so every TensorCore stays busy
            num_blocks = _round_up(max(num_blocks, 2 * ncores), ncores)
        R = min(r_target, _round_up(_ceil_div(rows, num_blocks), 128))
        num_blocks = _ceil_div(rows, R)   # ragged cdiv grid; edge block is masked

    # Pad t only by the sub-row remainder (< G elements); never pad whole rows.
    B_needed = rows * G
    if B_needed != B:
        t = jnp.pad(t, (0, B_needed - B))
    t2d = t.reshape(rows, G).T            # (G, rows): long axis on the lane dim

    # Fused per-column parameters: column 0 = linear, columns 1..D-1 = sin.
    w_full = jnp.concatenate([jnp.asarray(linear_w, jnp.float32).reshape(1), pw])
    b_full = jnp.concatenate([jnp.asarray(linear_b, jnp.float32).reshape(1), pb])

    expand = jnp.repeat(jnp.eye(G, dtype=jnp.float32), D, axis=1)         # (G, L)
    w_tiled = jnp.tile(w_full, (G,))[None, :]                              # (1, L)
    b_tiled = jnp.tile(b_full, (G,))[None, :]                              # (1, L)
    lin_mask = jnp.tile(
        jnp.concatenate([jnp.ones((1,), jnp.float32),
                         jnp.zeros((pdim,), jnp.float32)]), (G,))[None, :]  # (1, L)

    blk_vmem = per_row_bytes * R + resident_bytes
    vmem_limit = int(min(vmem_budget, max(32 << 20, blk_vmem + (4 << 20))))

    out_flat = pl.pallas_call(
        _time2vec_kernel,
        out_shape=jax.ShapeDtypeStruct((rows, L), out_dtype),
        grid_spec=pltpu.PrefetchScalarGridSpec(
            num_scalar_prefetch=0,
            grid=(num_blocks,),
            in_specs=[
                pl.BlockSpec((G, R), lambda i: (0, i)),   # transposed t (lane-dense)
                pl.BlockSpec((G, L), lambda i: (0, 0)),   # one-hot expand (resident)
                pl.BlockSpec((1, L), lambda i: (0, 0)),   # fused weights (resident)
                pl.BlockSpec((1, L), lambda i: (0, 0)),   # fused biases (resident)
                pl.BlockSpec((1, L), lambda i: (0, 0)),   # linear-column mask (resident)
            ],
            out_specs=pl.BlockSpec((R, L), lambda i: (i, 0)),
        ),
        compiler_params=pltpu.CompilerParams(
            dimension_semantics=("parallel",),
            vmem_limit_bytes=vmem_limit,
        ),
    )(t2d, expand, w_tiled, b_tiled, lin_mask)

    out = out_flat.reshape(B_needed, D)   # contiguous row-major reshape (free)
    if B_needed != B:
        out = out[:B]                     # only the < G-row pack remainder
    return out


def init_time2vec_params(dimension, key):
    """Deterministic re-implementation of Time2VecEncoding._reset_parameters."""
    pdim = dimension - 1
    k1, k2, k3 = jax.random.split(key, 3)

    # linear_w: xavier_uniform on a (1,1) view -> bound = sqrt(6/(1+1))
    bound_lin = math.sqrt(6.0 / 2.0)
    linear_w = jax.random.uniform(k1, (), jnp.float32, -bound_lin, bound_lin)
    linear_b = jnp.zeros((), jnp.float32)

    # periodic_w: xavier_uniform on (pdim, 1) -> bound = sqrt(6/(pdim+1)),
    # then scaled by frequency bands exp(-i * log(1e4)/pdim)
    bound_p = math.sqrt(6.0 / (pdim + 1.0))
    periodic_w = jax.random.uniform(k2, (pdim,), jnp.float32, -bound_p, bound_p)
    freq = jnp.exp(jnp.arange(pdim, dtype=jnp.float32) * (-math.log(10000.0) / pdim))
    periodic_w = periodic_w * freq

    # periodic_b: uniform(0, 2*pi)
    periodic_b = jax.random.uniform(k3, (pdim,), jnp.float32, 0.0, 2.0 * math.pi)
    return linear_w, linear_b, periodic_w, periodic_b


if __name__ == "__main__":
    dimension = 16      # output encoding width D (periodic_dim = 15)

    key = jax.random.PRNGKey(0)
    k_param, k_t = jax.random.split(key)
    params = init_time2vec_params(dimension, k_param)

    # (batch, block_rows override):
    #   8      : tiny single block (matches typical module usage)
    #   1003   : sub-row remainder -> t pad + output slice of < G rows
    #   20000  : larger auto-tiled case, B divisible by G (no pad, no slice)
    #   4096   : forced multi-block grid, exact division
    #   20001  : forced ragged multi-block grid + remainder slice
    cases = [(8, None), (1003, None), (20000, None), (4096, 128), (20001, 128)]

    for batch, brows in cases:
        t = jax.random.uniform(jax.random.fold_in(k_t, batch), (batch,),
                               jnp.float32, 0.0, 100.0)
        out = time2vec_forward(t, *params, use_pallas=True, block_rows=brows)
        out = jax.block_until_ready(out)

        ref = time2vec_reference(t, *params)
        np.testing.assert_allclose(np.asarray(out), np.asarray(ref),
                                   rtol=1e-5, atol=2e-5)
        assert out.shape == (batch, dimension)

    print("KERNEL_OK")
</pallas_src>

<mosaic_0001>
module attributes {stable_mosaic.version = 11 : i64} {
  func.func @_time2vec_kernel(%arg0: i32, %arg1: memref<8x1xf32, #tpu.memory_space<vmem>>, %arg2: memref<8x128xf32, #tpu.memory_space<vmem>>, %arg3: memref<1x128xf32, #tpu.memory_space<vmem>>, %arg4: memref<1x128xf32, #tpu.memory_space<vmem>>, %arg5: memref<1x128xf32, #tpu.memory_space<vmem>>, %arg6: memref<1x128xf32, #tpu.memory_space<vmem>>) attributes {dimension_semantics = [#tpu.dimension_semantics<parallel>], iteration_bounds = array<i64: 1>, scalar_prefetch = 0 : i64, scratch_operands = 0 : i64, tpu.core_type = #tpu.core_type<tc>, window_params = [{transform_indices = @transform_0, window_bounds = array<i64: 8, 1>}, {pipeline_mode = #tpu.pipeline_mode<synchronous>, transform_indices = @transform_1, window_bounds = array<i64: 8, 128>}, {pipeline_mode = #tpu.pipeline_mode<synchronous>, transform_indices = @transform_2, window_bounds = array<i64: 1, 128>}, {pipeline_mode = #tpu.pipeline_mode<synchronous>, transform_indices = @transform_3, window_bounds = array<i64: 1, 128>}, {pipeline_mode = #tpu.pipeline_mode<synchronous>, transform_indices = @transform_4, window_bounds = array<i64: 1, 128>}, {transform_indices = @transform_5, window_bounds = array<i64: 1, 128>}]} {
    %c0 = arith.constant 0 : index
    %c0_0 = arith.constant 0 : index
    %0 = vector.load %arg1[%c0, %c0_0] : memref<8x1xf32, #tpu.memory_space<vmem>>, vector<8x1xf32>
    %c0_1 = arith.constant 0 : index
    %c0_2 = arith.constant 0 : index
    %1 = vector.load %arg2[%c0_1, %c0_2] : memref<8x128xf32, #tpu.memory_space<vmem>>, vector<8x128xf32>
    %cst = arith.constant dense<0.000000e+00> : vector<1x128xf32>
    %2 = tpu.matmul %0, %1, %cst {dimension_numbers = #tpu.dot_dimension_numbers<[0], [0], [1], [1], [0, 1, 1, 1], [], []>, precision = #tpu.contract_precision<fp32>} : vector<8x1xf32>, vector<8x128xf32>, vector<1x128xf32> -> vector<1x128xf32>
    %c0_3 = arith.constant 0 : index
    %c0_4 = arith.constant 0 : index
    %3 = vector.load %arg3[%c0_3, %c0_4] : memref<1x128xf32, #tpu.memory_space<vmem>>, vector<1x128xf32>
    %4 = arith.mulf %2, %3 : vector<1x128xf32>
    %c0_5 = arith.constant 0 : index
    %c0_6 = arith.constant 0 : index
    %5 = vector.load %arg4[%c0_5, %c0_6] : memref<1x128xf32, #tpu.memory_space<vmem>>, vector<1x128xf32>
    %6 = arith.addf %4, %5 : vector<1x128xf32>
    %c0_7 = arith.constant 0 : index
    %c0_8 = arith.constant 0 : index
    %7 = vector.load %arg5[%c0_7, %c0_8] : memref<1x128xf32, #tpu.memory_space<vmem>>, vector<1x128xf32>
    %cst_9 = arith.constant 5.000000e-01 : f32
    %8 = vector.broadcast %cst_9 : f32 to vector<1x128xf32>
    %9 = arith.cmpf ogt, %7, %8 : vector<1x128xf32>
    %10 = math.sin %6 : vector<1x128xf32>
    %11 = arith.select %9, %6, %10 : vector<1x128xi1>, vector<1x128xf32>
    %c0_10 = arith.constant 0 : index
    %c0_11 = arith.constant 0 : index
    %12 = vector.load %arg6[%c0_10, %c0_11] : memref<1x128xf32, #tpu.memory_space<vmem>>, vector<1x128xf32>
    tpu.vector_store %arg6[%c0_10, %c0_11], %11 {strides = array<i32>} : memref<1x128xf32, #tpu.memory_space<vmem>>, vector<1x128xf32>,
    return
  }
  func.func @transform_0(%arg0: i32) -> (i32, i32) {
    %c0_i32 = arith.constant 0 : i32
    %c0_i32_0 = arith.constant 0 : i32
    return %c0_i32, %arg0 : i32, i32
  }
  func.func @transform_1(%arg0: i32) -> (i32, i32) {
    %c0_i32 = arith.constant 0 : i32
    %c0_i32_0 = arith.constant 0 : i32
    %c0_i32_1 = arith.constant 0 : i32
    return %c0_i32, %c0_i32_0 : i32, i32
  }
  func.func @transform_2(%arg0: i32) -> (i32, i32) {
    %c0_i32 = arith.constant 0 : i32
    %c0_i32_0 = arith.constant 0 : i32
    %c0_i32_1 = arith.constant 0 : i32
    return %c0_i32, %c0_i32_0 : i32, i32
  }
  func.func @transform_3(%arg0: i32) -> (i32, i32) {
    %c0_i32 = arith.constant 0 : i32
    %c0_i32_0 = arith.constant 0 : i32
    %c0_i32_1 = arith.constant 0 : i32
    return %c0_i32, %c0_i32_0 : i32, i32
  }
  func.func @transform_4(%arg0: i32) -> (i32, i32) {
    %c0_i32 = arith.constant 0 : i32
    %c0_i32_0 = arith.constant 0 : i32
    %c0_i32_1 = arith.constant 0 : i32
    return %c0_i32, %c0_i32_0 : i32, i32
  }
  func.func @transform_5(%arg0: i32) -> (i32, i32) {
    %c0_i32 = arith.constant 0 : i32
    %c0_i32_0 = arith.constant 0 : i32
    return %arg0, %c0_i32 : i32, i32
  }
}

</mosaic_0001>

<bundles_post_ra>
// kernel: tpu_custom_call.1
= control target key start
LH: loop header
LB: loop body
LE: loop exit
PB: predicated region body
PF: predicated region fallthrough
CT: control target
= control target key end

     0   :  { %s821_s0 = inlined_call_operand.vmem [shape: f32[8,1], index: 0, kind: input, shape index: {}]   ;;  %s822_s1 = inlined_call_operand.vmem [shape: f32[8,128], index: 1, kind: input, shape index: {}]   ;;  %s823_s2 = inlined_call_operand.vmem [shape: f32[1,128], index: 2, kind: input, shape index: {}]   ;;  %s824_s3 = inlined_call_operand.vmem [shape: f32[1,128], index: 3, kind: input, shape index: {}]   ;;  %s825_s4 = inlined_call_operand.vmem [shape: f32[1,128], index: 4, kind: input, shape index: {}]   ;;  %s826_s5 = inlined_call_operand.hbm [shape: f32[1,128], index: 5, kind: output, shape index: {}]  }
   0x1   :  { %v21_v0 = vld [vmem:[%s821_s0] sm:$0xff] }
   0x2   :  { %10 = vsyncpa [#allocation3], 0  ;;  %23 = vxpose.xlu0.b32.start.end [1/1] (short) (narrow) %v21_v0, 8  ;;  %v22_v1 = vld [vmem:[%s822_s1] sm:$0xff]  ;;  %v727_v2 = vmov 0.0   ;;  %vm728_vm0 = vmmov 0  }
   0x3   :  { %662 = vmatprep.subr.mxu0 %v727_v2  ;;  %v60_v3 = vand.u32 4294901760, %v22_v1  ;;  %664 = vmatprep.mubr.msk.f32.mxu0 %vm728_vm0, %v727_v2  ;;  %vm55_vm1 = vcmask 64512   ;;  %v505_v18 = vld [vmem:[%s823_s2] sm:$0x1]  ;;  %v729_v34 = vmov 683565275  }
   0x4   :  { %647 = vmatprep.subr.mxu1 %v727_v2  ;;  %649 = vmatprep.mubr.msk.f32.mxu1 %vm728_vm0, %v727_v2  ;;  %v507_v21 = vld [vmem:[%s824_s3] sm:$0x1]  ;;  %v730_v36 = vmov 2475754826   ;;  %v731_v39 = vmov 2131351028  }
   0x5   :  { %663 = vmatpush3.msra.mxu0 %v60_v3  ;;  %648 = vmatpush3.msra.mxu1 %v60_v3  ;;  %v137_v4 = vsub.f32 %v22_v1, %v60_v3  ;;  %v732_v42 = vmov 2102212464   ;;  %v733_v45 = vmov 920167782   ;;  %v734_v48 = vmov 1326507024  }
   0x6   :  { %652 = vmatprep.subr.mxu1 %v727_v2  ;;  %667 = vmatprep.subr.mxu0 %v727_v2  ;;  %s735_s24 = smov [#allocation2]  }
   0x7   :  { %v138_v7 = vand.u32 4294901760, %v137_v4  ;;  %s623_s25 = sshll.u32 %s735_s24, 4  ;;  %s624_s25 = int_to_ptr.vmem [resolvable:$true] %s623_s25 }
   0x8   :  { %s703_s26 = scalar_lea.vmem %s624_s25, 16  ;;  %p708_p1 = scmp.lt.s32.totalorder %s624_s25, %s624_s25 }
   0x9   :  { %v139_v10 = vsub.f32 %v137_v4, %v138_v7  ;;  %p704_p0 = scmp.ne.s32.totalorder %s624_s25, %s703_s26 }
   0xb   :  { %v140_v13 = vand.u32 4294901760, %v139_v10 }
  0x82   :  { %v39_v5 = vpop.trf.xlu0 }
  0x83   :  { %v57_v6 = vsel %vm55_vm1, %v39_v5, 0 }
  0x84   :  { %v125_v8 = vand.u32 4294901760, %v57_v6 }
  0x86   :  { %v126_v9 = vsub.f32 %v57_v6, %v125_v8 }
  0x88   :  { %v127_v11 = vand.u32 4294901760, %v126_v9 }
  0x8a   :  { %665 = vmatmul.mubr.f32.vlgmr.msra.gmra.mrb[0].mxu0 %v127_v11  ;;  %v128_v12 = vsub.f32 %v126_v9, %v127_v11 }
  0x8b   :  { %668 = vmatpush3.msra.mxu0 %v138_v7  ;;  %669 = vmatprep.mubr.msk.f32.mxu0 %vm728_vm0, %v727_v2 }
  0x8c   :  { %v129_v14 = vand.u32 4294901760, %v128_v12  ;;  %672 = vmatprep.subr.mxu0 %v727_v2 }
  0x8e   :  { %650 = vmatmul.mubr.f32.vlgmr.msra.gmra.mrb[0].mxu1 %v129_v14 }
  0x8f   :  { %653 = vmatpush3.msra.mxu1 %v140_v13  ;;  %654 = vmatprep.mubr.msk.f32.mxu1 %vm728_vm0, %v727_v2 }
  0x90   :  { %657 = vmatprep.subr.mxu1 %v727_v2 }
  0x92   :  { %670 = vmatmul.mubr.f32.vlgmr.msra.gmra.mrb[0].mxu0 %v125_v8 }
  0x93   :  { %673 = vmatpush3.msra.mxu0 %v60_v3  ;;  %674 = vmatprep.mubr.msk.f32.mxu0 %vm728_vm0, %v727_v2 }
  0x96   :  { %655 = vmatmul.mubr.f32.vlgmr.msra.gmra.mrb[0].mxu1 %v125_v8 }
  0x97   :  { %658 = vmatpush3.msra.mxu1 %v137_v4  ;;  %659 = vmatprep.mubr.msk.f32.mxu1 %vm728_vm0, %v727_v2 }
  0x9a   :  { %675 = vmatmul.mubr.f32.vlgmr.msra.gmra.mrb[0].mxu0 %v125_v8 }
  0x9e   :  { %660 = vmatmul.mubr.f32.vlgmr.msra.gmra.mrb[0].mxu1 %v126_v9 }
 0x16d   :  { %v501_v15 = vpop.f32.mrb[0].mxu0 }
 0x16e   :  { %v676_v16 = vpop.f32.mrb[1].mxu0 }
 0x171   :  { %v281_v17 = vpop.f32.mrb[0].mxu1 }
 0x172   :  { %v677_v19 = vadd.f32 %v501_v15, %v281_v17  ;;  %v661_v20 = vpop.f32.mrb[1].mxu1 }
 0x174   :  { %v506_v22 = vmul.f32 %v677_v19, %v505_v18 }
 0x176   :  { %v784_v23 = vadd.f32 %v507_v21, %v506_v22 }
 0x178   :  { %v514_v24 = vand.u32 2139095040, %v784_v23  ;;  %v511_v28 = vand.u32 2147483647, %v784_v23  ;;  %vm513_vm9 = vcmp.lt.s32.totalorder %v784_v23, 0  ;;  %vm603_vm15 = vweird.f32 %v784_v23 }
 0x17a   :  { %v515_v25 = vshrl.u32 %v514_v24, 23  ;;  %v518_v32 = vand.u32 8388607, %v511_v28  ;;  %vm512_vm10 = vcmp.le.f32.partialorder %v511_v28, 0.7853982 }
 0x17c   :  { %v631_v26 = vadd.s32 4294967169, %v515_v25  ;;  %v519_v50 = vor.u32 8388608, %v518_v32 }
 0x17e   :  { %v521_v27 = vadd.s32 1, %v631_v26  ;;  %v559_v0 = vshll.u32 %v519_v50, 8 }
 0x180   :  { %vm522_vm2 = vcmp.gt.s32.totalorder %v521_v27, 0 }
 0x181   :  { %v523_v29 = vsel %vm522_vm2, %v521_v27, 0 }
 0x182   :  { %v525_v30 = vand.u32 31, %v523_v29  ;;  %v524_v33 = vshrl.u32 %v523_v29, 5 }
 0x184   :  { %v526_v31 = vsub.s32 32, %v525_v30  ;;  %v528_v35 = vshll.u32 %v729_v34, %v525_v30  ;;  %v531_v37 = vshll.u32 %v730_v36, %v525_v30  ;;  %v534_v41 = vshll.u32 %v731_v39, %v525_v30 }
 0x185   :  { %v537_v44 = vshll.u32 %v732_v42, %v525_v30  ;;  %v540_v47 = vshll.u32 %v733_v45, %v525_v30  ;;  %vm543_vm3 = vcmp.lt.s32.totalorder %v524_v33, 1  ;;  %vm546_vm4 = vcmp.lt.s32.totalorder %v524_v33, 4 }
 0x186   :  { %v529_v38 = vshrl.u32 %v730_v36, %v526_v31  ;;  %v532_v40 = vshrl.u32 %v731_v39, %v526_v31  ;;  %v535_v43 = vshrl.u32 %v732_v42, %v526_v31  ;;  %v538_v46 = vshrl.u32 %v733_v45, %v526_v31 }
 0x187   :  { %v541_v49 = vshrl.u32 %v734_v48, %v526_v31  ;;  %v527_v59 = vshrl.u32 %v729_v34, %v526_v31  ;;  %vm545_vm5 = vcmp.lt.s32.totalorder %v524_v33, 3  ;;  %vm544_vm6 = vcmp.lt.s32.totalorder %v524_v33, 2 }
 0x188   :  { %v530_v51 = vor.u32 %v529_v38, %v528_v35  ;;  %v533_v52 = vor.u32 %v532_v40, %v531_v37  ;;  %v536_v53 = vor.u32 %v535_v43, %v534_v41  ;;  %v539_v54 = vor.u32 %v538_v46, %v537_v44 }
 0x189   :  { %v542_v55 = vor.u32 %v541_v49, %v540_v47  ;;  %v509_v47 = vld [vmem:[%s825_s4] sm:$0x1]  ;;  %s707_s4 = scalar_lea.vmem %s624_s25, 32 }
 0x18a   :  { %v548_v56 = vsel %vm546_vm4, %v536_v53, 2102212464  ;;  %v551_v57 = vsel %vm543_vm3, %v530_v51, %v533_v52  ;;  %v555_v58 = vsel %vm543_vm3, %v533_v52, %v536_v53  ;;  %v552_v60 = vsel %vm546_vm4, %v539_v54, 920167782  ;;  %p709_p2 = scmp.lt.s32.totalorder %s707_s4, %s703_s26 }
 0x18b   :  { %v556_v61 = vsel %vm546_vm4, %v542_v55, 1326507024  ;;  %v553_v62 = vsel %vm545_vm5, %v536_v53, %v552_v60  ;;  %v547_v1 = vsel %vm543_vm3, %v527_v59, %v530_v51  ;;  %v549_v2 = vsel %vm545_vm5, %v533_v52, %v548_v56 }
 0x18c   :  { %v557_v63 = vsel %vm545_vm5, %v539_v54, %v556_v61  ;;  %v554_v3 = vsel %vm544_vm6, %v551_v57, %v553_v62  ;;  %v550_v9 = vsel %vm544_vm6, %v547_v1, %v549_v2  ;;  %vm510_vm13 = vcmp.gt.f32.partialorder %v509_v47, 0.5  ;;  %p710_p3 = por %p709_p2, %p708_p1 }
 0x18d   :  { %v558_v4 = vsel %vm544_vm6, %v555_v58, %v557_v63  ;;  %v793_v7 = vmul.u32.u64.low %v559_v0, %v554_v3  ;;  %v794_v8 = vmul.u32.u64.high %v559_v0, %v554_v3, %v793_v7  ;;  %v566_v11 = vmul.u32 %v559_v0, %v550_v9 }
 0x18e   :  { %v790_v5 = vmul.u32.u64.low %v559_v0, %v558_v4  ;;  %v791_v6 = vmul.u32.u64.high %v559_v0, %v558_v4, %v790_v5  ;;  %p711_p4 = pnand %p710_p3, %p704_p0 }
 0x18f   :  { %v569_v10 = vadd.s32 1, %v794_v8 }
 0x190   :  { %vm568_vm7 = vc.u32 %v791_v6, %v793_v7  ;;  %v567_v24 = vadd.s32 %v793_v7, %v791_v6 }
 0x191   :  { %v570_v12 = vsel %vm568_vm7, %v569_v10, %v794_v8 }
 0x192   :  { %v571_v13 = vadd.s32 %v570_v12, %v566_v11 }
 0x194   :  { %v572_v14 = vadd.s32 536870912, %v571_v13 }
 0x196   :  { %v573_v15 = vshrl.u32 %v572_v14, 30 }
 0x198   :  { %v574_v16 = vshll.u32 %v573_v15, 30  ;;  %v597_v37 = vsub.s32 4, %v573_v15 }
 0x19a   :  { %v575_v17 = vsub.s32 %v571_v13, %v574_v16  ;;  %v598_v40 = vsel %vm513_vm9, %v597_v37, %v573_v15 }
 0x19b   :  { %v600_v42 = vsel %vm512_vm10, 0, %v598_v40 }
 0x19c   :  { %v577_v18 = vsub.s32 0, %v575_v17  ;;  %v604_v43 = vadd.s32 3, %v600_v42 }
 0x19e   :  { %v632_v19 = vmin.u32 %v577_v18, %v575_v17  ;;  %v605_v44 = vand.u32 3, %v604_v43 }
 0x1a0   :  { %v579_v20 = vclz %v632_v19  ;;  %vm610_vm11 = vcmp.eq.s32.totalorder %v605_v44, 2  ;;  %vm607_vm12 = vcmp.eq.s32.totalorder %v605_v44, 0  ;;  %vm606_vm14 = vcmp.lt.s32.totalorder %v605_v44, 2 }
 0x1a2   :  { %v633_v21 = vadd.s32 4294967294, %v579_v20 }
 0x1a4   :  { %vm634_vm8 = vcmp.lt.s32.totalorder %v633_v21, 0 }
 0x1a5   :  { %v582_v22 = vsel %vm634_vm8, 0, %v633_v21 }
 0x1a6   :  { %v583_v25 = vsub.s32 32, %v582_v22  ;;  %v587_v26 = vsub.s32 4294967266, %v582_v22  ;;  %v584_v27 = vshll.u32 %v575_v17, %v582_v22 }
 0x1a8   :  { %v585_v29 = vshrl.u32 %v567_v24, %v583_v25  ;;  %v588_v30 = vadd.s32 127, %v587_v26 }
 0x1aa   :  { %v586_v31 = vor.u32 %v585_v29, %v584_v27  ;;  %v589_v32 = vshll.u32 %v588_v30, 23 }
 0x1ac   :  { %v590_v33 = vor.u32 4788187, %v589_v32  ;;  %v593_v35 = vcvt.s32.f32 %v586_v31 }
 0x1ae   :  { %v591_v34 = vand.u32 2147483647, %v590_v33 }
 0x1b0   :  { %v594_v36 = vmul.f32 %v593_v35, %v591_v34 }
 0x1b2   :  { %v595_v38 = vxor.u32 2147483648, %v594_v36 }
 0x1b4   :  { %v596_v39 = vsel %vm513_vm9, %v595_v38, %v594_v36 }
 0x1b5   :  { %v599_v41 = vsel %vm512_vm10, %v784_v23, %v596_v39 }
 0x1b6   :  { %699 = vcosq.f32 %v599_v41 }
 0x1b7   :  { %701 = vsinq.f32 %v599_v41 }
 0x1c0   :  { %v700_v45 = vpop.eup %699 }
 0x1c1   :  { %v702_v46 = vpop.eup %701  ;;  %v611_v48 = vxor.u32 2147483648, %v700_v45 }
 0x1c2   :  { %v608_v49 = vxor.u32 2147483648, %v702_v46 }
 0x1c3   :  { %v612_v28 = vsel %vm610_vm11, %v611_v48, %v702_v46 }
 0x1c4   :  { %v609_v50 = vsel %vm607_vm12, %v700_v45, %v608_v49 }
 0x1c5   :  { %v613_v51 = vsel %vm606_vm14, %v609_v50, %v612_v28 }
 0x1c6   :  { %v614_v52 = vsel %vm603_vm15, nan, %v613_v51 }
 0x1c7   :  { %v615_v53 = vsel %vm510_vm13, %v784_v23, %v614_v52 }
 0x1c8   :  { %616 = vst [vmem:[#allocation2] sm:$0x1] %v615_v53 }
 0x1c9   :  { %714 = shalt.err (!%p711_p4)
}
 0x1ca   :  { %s715_s29 = scalar_lea.hbm %s826_s5, 16 }
 0x1cb   :  { %p716_p5 = scmp.ne.s32.totalorder %s826_s5, %s715_s29  ;;  %p719_p6 = scmp.lt.u32.totalorder %s715_s29, %s826_s5 }
 0x1cd   :  { %p721_p7 = pnand %p719_p6, %p716_p5 }
 0x1cf   :  { %724 = shalt.err (!%p721_p7)
}
 0x1d0   :  { %626 = dma.vmem_to_hbm [thread:$0]  %s624_s25, 16, %s826_s5, [#allocation3]  }
 0x1d1   :  { %725 = dma.done.wait [#allocation3], 16  }
 0x1d2   :  { %726 = vsyncadd [#allocation3], 4294967280 }
 0x1d3   :  { %630 = vsyncpa [#allocation3], 1 }

</bundles_post_ra>
